<compile_context>
chip_gen: v5e
topology: v5e:2x2
jax: 0.10.0
libtpu: 0.0.40
codegen_flags: <defaults>
</compile_context>

<pallas_src>
import math
import jax
import jax.numpy as jnp
from jax.experimental import pallas as pl
from jax.experimental.pallas import tpu as pltpu

LANES = 128
SUBLANES = 8
MAX_TB = 8192  # keeps f32 h1/h2 temporaries + buffers well inside v5e's 16 MiB scoped VMEM


def _round_up(n, m):
    return (n + m - 1) // m * m


def _telu(v, alpha):
    # TeLU per the PyTorch spec: where(x>=0, x, alpha*(exp(x)-1)).
    # exp is evaluated on min(v, 0) so the dead branch never overflows.
    return jnp.where(v >= 0, v, alpha * (jnp.exp(jnp.minimum(v, 0.0)) - 1.0))


def ffnn_kernel(x_ref, w1_ref, b1_ref, w2_ref, b2_ref, w3_ref, b3_ref, o_ref):
    x = x_ref[...]

    # fc1 + TeLU(alpha=0.15)
    h1 = jnp.dot(x, w1_ref[...], preferred_element_type=jnp.float32) + b1_ref[...]
    h1 = _telu(h1, 0.15)

    # fc2 + TeLU(alpha=0.1)
    h2 = jnp.dot(h1, w2_ref[...], preferred_element_type=jnp.float32) + b2_ref[...]
    h2 = _telu(h2, 0.1)

    # fc3 (logits, no activation) -> (tb, 8) store (narrow, masked — negligible here)
    o_ref[...] = jnp.dot(h2, w3_ref[...], preferred_element_type=jnp.float32) + b3_ref[...]


def pad_params(params):
    """One-time zero-padding of weights/biases to TPU-friendly widths.

    Hidden dims pad to 128 lanes (MXU/lane-dense), the 2-wide logits pad only to 8.
    Zero padding is exact: padded bias is 0, TeLU(0)=0, padded weight rows are 0.
    """
    h1 = params["w1"].shape[1]            # 32
    h2 = params["w2"].shape[1]            # 64
    out_features = params["w3"].shape[1]  # 2

    h1p = _round_up(h1, LANES)
    h2p = _round_up(h2, LANES)
    outp = _round_up(out_features, SUBLANES)

    return {
        "w1": jnp.pad(params["w1"], ((0, 0), (0, h1p - h1))),
        "b1": jnp.pad(params["b1"], ((0, 0), (0, h1p - h1))),
        "w2": jnp.pad(params["w2"], ((0, h1p - h1), (0, h2p - h2))),
        "b2": jnp.pad(params["b2"], ((0, 0), (0, h2p - h2))),
        "w3": jnp.pad(params["w3"], ((0, h2p - h2), (0, outp - out_features))),
        "b3": jnp.pad(params["b3"], ((0, 0), (0, outp - out_features))),
        "out_features": out_features,
    }


def ffnn_forward(x, padded_params, *, tb=4096):
    """x: (B, input_size) float32. padded_params: output of pad_params()."""
    B, in_features = x.shape
    p = padded_params
    h1p = p["w1"].shape[1]
    h2p = p["w2"].shape[1]
    outp = p["w3"].shape[1]
    out_features = p["out_features"]

    # Batch tile: cap for VMEM, keep >= 2 grid steps for mid/large batches so both
    # v7x TensorCores get work, and round to a multiple of 8 (sublane rule).
    tb = max(SUBLANES, min(tb, MAX_TB))
    tb = min(tb, _round_up(pl.cdiv(B, 2), SUBLANES))
    tb = _round_up(tb, SUBLANES)

    grid = (pl.cdiv(B, tb),)  # ragged last block: Pallas masks out-of-bounds writes

    cost = pl.CostEstimate(
        flops=2 * B * (in_features * h1p + h1p * h2p + h2p * outp),
        transcendentals=B * (h1p + h2p),
        bytes_accessed=4 * (x.size
                            + p["w1"].size + p["b1"].size
                            + p["w2"].size + p["b2"].size
                            + p["w3"].size + p["b3"].size
                            + B * outp),
    )

    out = pl.pallas_call(
        ffnn_kernel,
        out_shape=jax.ShapeDtypeStruct((B, outp), jnp.float32),
        grid=grid,
        in_specs=[
            # Activations: tiled over batch (auto double-buffered).
            pl.BlockSpec((tb, in_features), lambda i: (i, 0)),
            # Weights / biases: constant block index -> resident in VMEM across the grid.
            pl.BlockSpec((in_features, h1p), lambda i: (0, 0)),
            pl.BlockSpec((1, h1p), lambda i: (0, 0)),
            pl.BlockSpec((h1p, h2p), lambda i: (0, 0)),
            pl.BlockSpec((1, h2p), lambda i: (0, 0)),
            pl.BlockSpec((h2p, outp), lambda i: (0, 0)),
            pl.BlockSpec((1, outp), lambda i: (0, 0)),
        ],
        out_specs=pl.BlockSpec((tb, outp), lambda i: (i, 0)),
        compiler_params=pltpu.CompilerParams(
            dimension_semantics=("parallel",),
        ),
        cost_estimate=cost,
    )(x, p["w1"], p["b1"], p["w2"], p["b2"], p["w3"], p["b3"])

    # Strip only the small lane padding of the 2-wide logits.
    return out[:, :out_features]


def xavier_uniform(key, fan_in, fan_out):
    # Matches torch.nn.init.xavier_uniform_ (gain=1): U(-a, a), a = sqrt(6/(fan_in+fan_out)).
    a = math.sqrt(6.0 / (fan_in + fan_out))
    return jax.random.uniform(key, (fan_in, fan_out), jnp.float32, minval=-a, maxval=a)


def init_params(key, input_size):
    k1, k2, k3 = jax.random.split(key, 3)
    return {
        "w1": xavier_uniform(k1, input_size, 32),
        "b1": jnp.zeros((1, 32), jnp.float32),
        "w2": xavier_uniform(k2, 32, 64),
        "b2": jnp.zeros((1, 64), jnp.float32),
        "w3": xavier_uniform(k3, 64, 2),
        "b3": jnp.zeros((1, 2), jnp.float32),
    }


def ffnn_reference(x, p):
    def telu(v, alpha):
        return jnp.where(v >= 0, v, alpha * (jnp.exp(v) - 1.0))
    h = telu(x @ p["w1"] + p["b1"], 0.15)
    h = telu(h @ p["w2"] + p["b2"], 0.1)
    return h @ p["w3"] + p["b3"]


if __name__ == "__main__":
    key = jax.random.PRNGKey(0)
    kx, kp, kx2 = jax.random.split(key, 3)

    batch, input_size = 8, 16
    params = init_params(kp, input_size)
    padded = pad_params(params)  # one-time padding, reused across forward calls

    # Small case (single tile).
    x = jax.random.normal(kx, (batch, input_size), jnp.float32)
    out = jax.block_until_ready(ffnn_forward(x, padded))
    ref = ffnn_reference(x, params)
    assert out.shape == (batch, 2)
    assert jnp.allclose(out, ref, atol=1e-5, rtol=1e-5)

    # Multi-tile ragged case (exercises batch grid, masked last block, parallel semantics).
    x2 = jax.random.normal(kx2, (300, input_size), jnp.float32)
    out2 = jax.block_until_ready(ffnn_forward(x2, padded, tb=128))
    ref2 = ffnn_reference(x2, params)
    assert out2.shape == (300, 2)
    assert jnp.allclose(out2, ref2, atol=1e-5, rtol=1e-5)

    print("KERNEL_OK")
</pallas_src>

<mosaic_0001>
module attributes {stable_mosaic.version = 11 : i64} {
  func.func @ffnn_kernel(%arg0: i32, %arg1: memref<8x16xf32, #tpu.memory_space<vmem>>, %arg2: memref<16x128xf32, #tpu.memory_space<vmem>>, %arg3: memref<1x128xf32, #tpu.memory_space<vmem>>, %arg4: memref<128x128xf32, #tpu.memory_space<vmem>>, %arg5: memref<1x128xf32, #tpu.memory_space<vmem>>, %arg6: memref<128x8xf32, #tpu.memory_space<vmem>>, %arg7: memref<1x8xf32, #tpu.memory_space<vmem>>, %arg8: memref<8x8xf32, #tpu.memory_space<vmem>>) attributes {dimension_semantics = [#tpu.dimension_semantics<parallel>], iteration_bounds = array<i64: 1>, scalar_prefetch = 0 : i64, scratch_operands = 0 : i64, tpu.core_type = #tpu.core_type<tc>, window_params = [{transform_indices = @transform_0, window_bounds = array<i64: 8, 16>}, {pipeline_mode = #tpu.pipeline_mode<synchronous>, transform_indices = @transform_1, window_bounds = array<i64: 16, 128>}, {pipeline_mode = #tpu.pipeline_mode<synchronous>, transform_indices = @transform_2, window_bounds = array<i64: 1, 128>}, {pipeline_mode = #tpu.pipeline_mode<synchronous>, transform_indices = @transform_3, window_bounds = array<i64: 128, 128>}, {pipeline_mode = #tpu.pipeline_mode<synchronous>, transform_indices = @transform_4, window_bounds = array<i64: 1, 128>}, {pipeline_mode = #tpu.pipeline_mode<synchronous>, transform_indices = @transform_5, window_bounds = array<i64: 128, 8>}, {pipeline_mode = #tpu.pipeline_mode<synchronous>, transform_indices = @transform_6, window_bounds = array<i64: 1, 8>}, {transform_indices = @transform_7, window_bounds = array<i64: 8, 8>}]} {
    %c0 = arith.constant 0 : index
    %c0_0 = arith.constant 0 : index
    %0 = vector.load %arg1[%c0, %c0_0] : memref<8x16xf32, #tpu.memory_space<vmem>>, vector<8x16xf32>
    %c0_1 = arith.constant 0 : index
    %c0_2 = arith.constant 0 : index
    %1 = vector.load %arg2[%c0_1, %c0_2] : memref<16x128xf32, #tpu.memory_space<vmem>>, vector<16x128xf32>
    %cst = arith.constant dense<0.000000e+00> : vector<8x128xf32>
    %2 = tpu.matmul %0, %1, %cst {dimension_numbers = #tpu.dot_dimension_numbers<[1], [0], [0], [1], [0, 0, 1, 1], [], []>} : vector<8x16xf32>, vector<16x128xf32>, vector<8x128xf32> -> vector<8x128xf32>
    %c0_3 = arith.constant 0 : index
    %c0_4 = arith.constant 0 : index
    %3 = vector.load %arg3[%c0_3, %c0_4] : memref<1x128xf32, #tpu.memory_space<vmem>>, vector<1x128xf32>
    %4 = vector.broadcast %3 : vector<1x128xf32> to vector<8x128xf32>
    %5 = arith.addf %2, %4 : vector<8x128xf32>
    %cst_5 = arith.constant 0.000000e+00 : f32
    %6 = vector.broadcast %cst_5 : f32 to vector<8x128xf32>
    %7 = arith.cmpf oge, %5, %6 : vector<8x128xf32>
    %cst_6 = arith.constant 0.000000e+00 : f32
    %8 = vector.broadcast %cst_6 : f32 to vector<8x128xf32>
    %9 = arith.minimumf %5, %8 : vector<8x128xf32>
    %10 = math.exp %9 : vector<8x128xf32>
    %cst_7 = arith.constant 1.000000e+00 : f32
    %11 = vector.broadcast %cst_7 : f32 to vector<8x128xf32>
    %12 = arith.subf %10, %11 : vector<8x128xf32>
    %cst_8 = arith.constant 1.500000e-01 : f32
    %13 = vector.broadcast %cst_8 : f32 to vector<8x128xf32>
    %14 = arith.mulf %13, %12 : vector<8x128xf32>
    %15 = arith.select %7, %5, %14 : vector<8x128xi1>, vector<8x128xf32>
    %c0_9 = arith.constant 0 : index
    %c0_10 = arith.constant 0 : index
    %16 = vector.load %arg4[%c0_9, %c0_10] : memref<128x128xf32, #tpu.memory_space<vmem>>, vector<128x128xf32>
    %cst_11 = arith.constant dense<0.000000e+00> : vector<8x128xf32>
    %17 = tpu.matmul %15, %16, %cst_11 {dimension_numbers = #tpu.dot_dimension_numbers<[1], [0], [0], [1], [0, 0, 1, 1], [], []>} : vector<8x128xf32>, vector<128x128xf32>, vector<8x128xf32> -> vector<8x128xf32>
    %c0_12 = arith.constant 0 : index
    %c0_13 = arith.constant 0 : index
    %18 = vector.load %arg5[%c0_12, %c0_13] : memref<1x128xf32, #tpu.memory_space<vmem>>, vector<1x128xf32>
    %19 = vector.broadcast %18 : vector<1x128xf32> to vector<8x128xf32>
    %20 = arith.addf %17, %19 : vector<8x128xf32>
    %cst_14 = arith.constant 0.000000e+00 : f32
    %21 = vector.broadcast %cst_14 : f32 to vector<8x128xf32>
    %22 = arith.cmpf oge, %20, %21 : vector<8x128xf32>
    %cst_15 = arith.constant 0.000000e+00 : f32
    %23 = vector.broadcast %cst_15 : f32 to vector<8x128xf32>
    %24 = arith.minimumf %20, %23 : vector<8x128xf32>
    %25 = math.exp %24 : vector<8x128xf32>
    %cst_16 = arith.constant 1.000000e+00 : f32
    %26 = vector.broadcast %cst_16 : f32 to vector<8x128xf32>
    %27 = arith.subf %25, %26 : vector<8x128xf32>
    %cst_17 = arith.constant 1.000000e-01 : f32
    %28 = vector.broadcast %cst_17 : f32 to vector<8x128xf32>
    %29 = arith.mulf %28, %27 : vector<8x128xf32>
    %30 = arith.select %22, %20, %29 : vector<8x128xi1>, vector<8x128xf32>
    %c0_18 = arith.constant 0 : index
    %c0_19 = arith.constant 0 : index
    %31 = vector.load %arg6[%c0_18, %c0_19] : memref<128x8xf32, #tpu.memory_space<vmem>>, vector<128x8xf32>
    %cst_20 = arith.constant dense<0.000000e+00> : vector<8x8xf32>
    %32 = tpu.matmul %30, %31, %cst_20 {dimension_numbers = #tpu.dot_dimension_numbers<[1], [0], [0], [1], [0, 0, 1, 1], [], []>} : vector<8x128xf32>, vector<128x8xf32>, vector<8x8xf32> -> vector<8x8xf32>
    %c0_21 = arith.constant 0 : index
    %c0_22 = arith.constant 0 : index
    %33 = vector.load %arg7[%c0_21, %c0_22] : memref<1x8xf32, #tpu.memory_space<vmem>>, vector<1x8xf32>
    %34 = vector.broadcast %33 : vector<1x8xf32> to vector<8x8xf32>
    %35 = arith.addf %32, %34 : vector<8x8xf32>
    %c0_23 = arith.constant 0 : index
    %c0_24 = arith.constant 0 : index
    %36 = vector.load %arg8[%c0_23, %c0_24] : memref<8x8xf32, #tpu.memory_space<vmem>>, vector<8x8xf32>
    tpu.vector_store %arg8[%c0_23, %c0_24], %35 {strides = array<i32>} : memref<8x8xf32, #tpu.memory_space<vmem>>, vector<8x8xf32>,
    return
  }
  func.func @transform_0(%arg0: i32) -> (i32, i32) {
    %c0_i32 = arith.constant 0 : i32
    %c0_i32_0 = arith.constant 0 : i32
    return %arg0, %c0_i32 : i32, i32
  }
  func.func @transform_1(%arg0: i32) -> (i32, i32) {
    %c0_i32 = arith.constant 0 : i32
    %c0_i32_0 = arith.constant 0 : i32
    %c0_i32_1 = arith.constant 0 : i32
    return %c0_i32, %c0_i32_0 : i32, i32
  }
  func.func @transform_2(%arg0: i32) -> (i32, i32) {
    %c0_i32 = arith.constant 0 : i32
    %c0_i32_0 = arith.constant 0 : i32
    %c0_i32_1 = arith.constant 0 : i32
    return %c0_i32, %c0_i32_0 : i32, i32
  }
  func.func @transform_3(%arg0: i32) -> (i32, i32) {
    %c0_i32 = arith.constant 0 : i32
    %c0_i32_0 = arith.constant 0 : i32
    %c0_i32_1 = arith.constant 0 : i32
    return %c0_i32, %c0_i32_0 : i32, i32
  }
  func.func @transform_4(%arg0: i32) -> (i32, i32) {
    %c0_i32 = arith.constant 0 : i32
    %c0_i32_0 = arith.constant 0 : i32
    %c0_i32_1 = arith.constant 0 : i32
    return %c0_i32, %c0_i32_0 : i32, i32
  }
  func.func @transform_5(%arg0: i32) -> (i32, i32) {
    %c0_i32 = arith.constant 0 : i32
    %c0_i32_0 = arith.constant 0 : i32
    %c0_i32_1 = arith.constant 0 : i32
    return %c0_i32, %c0_i32_0 : i32, i32
  }
  func.func @transform_6(%arg0: i32) -> (i32, i32) {
    %c0_i32 = arith.constant 0 : i32
    %c0_i32_0 = arith.constant 0 : i32
    %c0_i32_1 = arith.constant 0 : i32
    return %c0_i32, %c0_i32_0 : i32, i32
  }
  func.func @transform_7(%arg0: i32) -> (i32, i32) {
    %c0_i32 = arith.constant 0 : i32
    %c0_i32_0 = arith.constant 0 : i32
    return %arg0, %c0_i32 : i32, i32
  }
}

</mosaic_0001>

<bundles_post_ra>
// kernel: tpu_custom_call.1
= control target key start
LH: loop header
LB: loop body
LE: loop exit
PB: predicated region body
PF: predicated region fallthrough
CT: control target
= control target key end

     0   :  { %12 = vsyncpa [#allocation3], 0  ;;  %s411_s0 = inlined_call_operand.vmem [shape: f32[8,16], index: 0, kind: input, shape index: {}]   ;;  %s412_s1 = inlined_call_operand.hbm [shape: f32[16,128], index: 1, kind: input, shape index: {}]   ;;  %s413_s2 = inlined_call_operand.vmem [shape: f32[1,128], index: 2, kind: input, shape index: {}]   ;;  %s414_s3 = inlined_call_operand.vmem [shape: f32[128,128], index: 3, kind: input, shape index: {}]   ;;  %s415_s4 = inlined_call_operand.vmem [shape: f32[1,128], index: 4, kind: input, shape index: {}]   ;;  %s416_s5 = inlined_call_operand.vmem [shape: f32[128,8], index: 5, kind: input, shape index: {}]   ;;  %s417_s6 = inlined_call_operand.vmem [shape: f32[1,8], index: 6, kind: input, shape index: {}]   ;;  %s418_s7 = inlined_call_operand.hbm [shape: f32[8,8], index: 7, kind: output, shape index: {}]  }
   0x1   :  { %13 = vsyncpa [#allocation4], 0  ;;  %s20_s26 = sshll.u32 %s412_s1, 4  ;;  %s253_s27 = smov [#allocation2]   ;;  %s21_s26 = int_to_ptr.hbm [resolvable:$true] %s20_s26 }
   0x2   :  { %s22_s28 = sshll.u32 %s253_s27, 4  ;;  %s254_s29 = smov 128   ;;  %s23_s28 = int_to_ptr.vmem [resolvable:$true] %s22_s28 }
   0x3   :  { %s255_s30 = smov 8  }
   0x4   :  { %28 = dma.hbm_to_vmem [thread:$0]  %s21_s26, 256, %s23_s28, [#allocation3], %s254_s29, %s254_s29, %s255_s30  }
   0x5   :  { %249 = dma.done.wait [#allocation3], 256  }
   0x6   :  { %250 = vsyncadd [#allocation3], 4294967040  ;;  %v45_v0 = vld [vmem:[#allocation2 + $0x8] sm:$0xff]  ;;  %v44_v1 = vld [vmem:[#allocation2] sm:$0xff]  ;;  %vm50_vm0 = vcmask 130048   ;;  %vm168_vm3 = vcmask 64512  }
   0x7   :  { %68 = vmatpush.msra.mxu0 %v45_v0  ;;  %v43_v2 = vld [vmem:[%s411_s0] sm:$0xff]  ;;  %v96_v3 = vld [vmem:[%s414_s3 + $0x78] sm:$0xff]  ;;  %v95_v4 = vld [vmem:[%s414_s3 + $0x70] sm:$0xff] }
   0x8   :  { %101 = vmatpush.msra.mxu1 %v96_v3  ;;  %v94_v5 = vld [vmem:[%s414_s3 + $0x68] sm:$0xff]  ;;  %v93_v6 = vld [vmem:[%s414_s3 + $0x60] sm:$0xff]  ;;  %v92_v7 = vld [vmem:[%s414_s3 + $0x58] sm:$0xff] }
   0x9   :  { %69 = vmatpush.msra.mxu0 %v44_v1  ;;  %v91_v8 = vld [vmem:[%s414_s3 + $0x50] sm:$0xff]  ;;  %v90_v9 = vld [vmem:[%s414_s3 + $0x48] sm:$0xff]  ;;  %v89_v10 = vld [vmem:[%s414_s3 + $0x40] sm:$0xff] }
   0xa   :  { %187 = vmatmul.msk.f32.vlgmr.msra.gmra.mxu0 %vm50_vm0, %v43_v2  ;;  %102 = vmatpush.msra.mxu1 %v95_v4  ;;  %v88_v11 = vld [vmem:[%s414_s3 + $0x38] sm:$0xff]  ;;  %v87_v12 = vld [vmem:[%s414_s3 + $0x30] sm:$0xff]  ;;  %v86_v13 = vld [vmem:[%s414_s3 + $0x28] sm:$0xff] }
   0xb   :  { %v85_v14 = vld [vmem:[%s414_s3 + $0x20] sm:$0xff]  ;;  %v84_v15 = vld [vmem:[%s414_s3 + $0x18] sm:$0xff]  ;;  %v83_v16 = vld [vmem:[%s414_s3 + $0x10] sm:$0xff] }
   0xc   :  { %103 = vmatpush.msra.mxu1 %v94_v5  ;;  %v82_v17 = vld [vmem:[%s414_s3 + $0x8] sm:$0xff]  ;;  %v81_v18 = vld [vmem:[%s414_s3] sm:$0xff]  ;;  %v143_v19 = vld [vmem:[%s416_s5 + $0x78] sm:$0xff] }
   0xd   :  { %v142_v20 = vld [vmem:[%s416_s5 + $0x70] sm:$0xff]  ;;  %148 = vmatpush.msra.mxu2 %v143_v19  ;;  %v141_v21 = vld [vmem:[%s416_s5 + $0x68] sm:$0xff]  ;;  %v140_v22 = vld [vmem:[%s416_s5 + $0x60] sm:$0xff] }
   0xe   :  { %104 = vmatpush.msra.mxu1 %v93_v6  ;;  %v139_v23 = vld [vmem:[%s416_s5 + $0x58] sm:$0xff]  ;;  %v138_v24 = vld [vmem:[%s416_s5 + $0x50] sm:$0xff]  ;;  %v194_v25 = vld [vmem:[%s413_s2] ss:$0 sm:$0xff] }
   0xf   :  { %149 = vmatpush.msra.mxu2 %v142_v20  ;;  %v137_v34 = vld [vmem:[%s416_s5 + $0x48] sm:$0xff]  ;;  %v136_v35 = vld [vmem:[%s416_s5 + $0x40] sm:$0xff]  ;;  %v135_v36 = vld [vmem:[%s416_s5 + $0x38] sm:$0xff] }
  0x10   :  { %105 = vmatpush.msra.mxu1 %v92_v7  ;;  %v134_v37 = vld [vmem:[%s416_s5 + $0x30] sm:$0xff]  ;;  %v133_v38 = vld [vmem:[%s416_s5 + $0x28] sm:$0xff]  ;;  %v132_v39 = vld [vmem:[%s416_s5 + $0x20] sm:$0xff] }
  0x11   :  { %150 = vmatpush.msra.mxu2 %v141_v21  ;;  %v131_v40 = vld [vmem:[%s416_s5 + $0x18] sm:$0xff]  ;;  %v130_v41 = vld [vmem:[%s416_s5 + $0x10] sm:$0xff]  ;;  %v129_v42 = vld [vmem:[%s416_s5 + $0x8] sm:$0xff] }
  0x12   :  { %106 = vmatpush.msra.mxu1 %v91_v8  ;;  %v128_v43 = vld [vmem:[%s416_s5] sm:$0xff]  ;;  %s256_s5 = smov [#allocation5]  }
  0x13   :  { %151 = vmatpush.msra.mxu2 %v140_v22  ;;  %v195_v44 = vld [vmem:[%s415_s4] ss:$0 sm:$0xff]  ;;  %s175_s25 = sshll.u32 %s256_s5, 4  ;;  %s177_s4 = sshll.u32 %s418_s7, 4  ;;  %s176_s25 = int_to_ptr.vmem [resolvable:$true] %s175_s25  ;;  %s178_s4 = int_to_ptr.hbm [resolvable:$true] %s177_s4 }
  0x14   :  { %107 = vmatpush.msra.mxu1 %v90_v9  ;;  %v196_v53 = vld [vmem:[%s417_s6] ss:$0 sm:$0xff] }
  0x15   :  { %152 = vmatpush.msra.mxu2 %v139_v23 }
  0x16   :  { %108 = vmatpush.msra.mxu1 %v89_v10 }
  0x17   :  { %153 = vmatpush.msra.mxu2 %v138_v24 }
  0x18   :  { %109 = vmatpush.msra.mxu1 %v88_v11 }
  0x19   :  { %154 = vmatpush.msra.mxu2 %v137_v34 }
  0x1a   :  { %110 = vmatpush.msra.mxu1 %v87_v12 }
  0x1b   :  { %155 = vmatpush.msra.mxu2 %v136_v35 }
  0x1c   :  { %111 = vmatpush.msra.mxu1 %v86_v13 }
  0x1d   :  { %156 = vmatpush.msra.mxu2 %v135_v36 }
  0x1e   :  { %112 = vmatpush.msra.mxu1 %v85_v14 }
  0x1f   :  { %157 = vmatpush.msra.mxu2 %v134_v37 }
  0x20   :  { %113 = vmatpush.msra.mxu1 %v84_v15 }
  0x21   :  { %158 = vmatpush.msra.mxu2 %v133_v38 }
  0x22   :  { %114 = vmatpush.msra.mxu1 %v83_v16 }
  0x23   :  { %159 = vmatpush.msra.mxu2 %v132_v39 }
  0x24   :  { %115 = vmatpush.msra.mxu1 %v82_v17 }
  0x25   :  { %160 = vmatpush.msra.mxu2 %v131_v40 }
  0x26   :  { %116 = vmatpush.msra.mxu1 %v81_v18 }
  0x27   :  { %161 = vmatpush.msra.mxu2 %v130_v41 }
  0x29   :  { %162 = vmatpush.msra.mxu2 %v129_v42 }
  0x2b   :  { %163 = vmatpush.msra.mxu2 %v128_v43 }
  0x87   :  { %v71_v26 = vpop.f32.mrf.mxu0 }
  0x88   :  { %v72_v27 = vadd.f32 %v194_v25, %v71_v26 }
  0x8a   :  { %v75_v28 = vmin.f32 %v72_v27, 0.0  ;;  %vm74_vm1 = vcmp.ge.f32.partialorder %v72_v27, 0.0 }
  0x8c   :  { %v76_v29 = vmul.f32 1.442695, %v75_v28 }
  0x8e   :  { %197 = vpow2.f32 %v76_v29 }
  0x94   :  { %v198_v30 = vpop.eup %197 }
  0x95   :  { %v188_v31 = vadd.f32 -1.0, %v198_v30 }
  0x97   :  { %v79_v32 = vmul.f32 0.15, %v188_v31 }
  0x99   :  { %v80_v33 = vsel %vm74_vm1, %v72_v27, %v79_v32 }
  0x9a   :  { %117 = vmatmul.f32.vlgmr.msra.gmra.mxu1 %v80_v33 }
 0x117   :  { %v118_v45 = vpop.f32.mrf.mxu1 }
 0x118   :  { %v119_v46 = vadd.f32 %v195_v44, %v118_v45 }
 0x11a   :  { %v122_v47 = vmin.f32 %v119_v46, 0.0  ;;  %vm121_vm2 = vcmp.ge.f32.partialorder %v119_v46, 0.0 }
 0x11c   :  { %v123_v48 = vmul.f32 1.442695, %v122_v47 }
 0x11e   :  { %199 = vpow2.f32 %v123_v48 }
 0x124   :  { %v200_v49 = vpop.eup %199 }
 0x125   :  { %v189_v50 = vadd.f32 -1.0, %v200_v49 }
 0x127   :  { %v126_v51 = vmul.f32 0.1, %v189_v50 }
 0x129   :  { %v127_v52 = vsel %vm121_vm2, %v119_v46, %v126_v51 }
 0x12a   :  { %164 = vmatmul.f32.vlgmr.msra.gmra.mxu2 %v127_v52 }
 0x1ad   :  { %v165_v54 = vpop.f32.mrf.mxu2 }
 0x1ae   :  { %v166_v55 = vadd.f32 %v196_v53, %v165_v54 }
 0x1b0   :  { %169 = vst.msk [vmem:[#allocation5] sm:$0xff] %vm168_vm3, %v166_v55 }
 0x1b1   :  { %180 = dma.vmem_to_hbm [thread:$0]  %s176_s25, 128, %s178_s4, [#allocation4]  }
 0x1b2   :  { %251 = dma.done.wait [#allocation4], 128  }
 0x1b3   :  { %252 = vsyncadd [#allocation4], 4294967168 }
 0x1b4   :  { %185 = vsyncpa [#allocation3], 1 }
 0x1b5   :  { %186 = vsyncpa [#allocation4], 1 }

</bundles_post_ra>
